<compile_context>
chip_gen: v7x
topology: tpu7x:2x2x1
jax: 0.10.0
libtpu: 0.0.40
codegen_flags: <defaults>
</compile_context>

<pallas_src>
import math

import jax
import jax.numpy as jnp
import numpy as np
from jax.experimental import pallas as pl
from jax.experimental.pallas import tpu as pltpu


def _aml_kernel(x_ref, v_ref, w_ref, o_ref):
    # x_ref: (L, TM, H) input dtype   v_ref: (1, H) f32 (pre-scaled by 1/sqrt(768))
    # w_ref: (H, H) native dtype      o_ref: (TM, H)
    num_layers = x_ref.shape[0]

    v_row = v_ref[...]                                   # (1, H) f32, resident
    w = w_ref[...]                                       # (H, H), resident

    # ---- layer-attention logits on the VPU/XLU (no MXU matvecs) ----
    # per layer: elementwise multiply by the query row (promotes to f32), then a
    # lane reduce -> (TM, 1); stitch lane-dense into (TM, L).
    logit_cols = [
        jnp.sum(x_ref[l] * v_row, axis=-1, keepdims=True)        # (TM, 1) f32
        for l in range(num_layers)
    ]
    logits = jnp.concatenate(logit_cols, axis=-1)                 # (TM, L) f32

    # ---- numerically-stable, EXACT softmax over the layer axis ----
    m = jnp.max(logits, axis=-1, keepdims=True)                   # (TM, 1)
    e = jnp.exp(logits - m)                                       # (TM, L)
    denom = jnp.sum(e, axis=-1, keepdims=True)                    # (TM, 1)
    weights = e / denom                                           # (TM, L) f32, exact

    # ---- layer mix: grouped f32 accumulation (cuts vst writeback traffic) ----
    group = 4
    acc = None
    for start in range(0, num_layers, group):
        part = None
        for l in range(start, min(start + group, num_layers)):
            t = x_ref[l] * weights[:, l:l + 1]                    # (TM, H) f32
            part = t if part is None else part + t
        acc = part if acc is None else acc + part                 # (TM, H) f32

    # ---- final projection on the MXU (f32 accumulate) ----
    out = jnp.dot(acc.astype(w.dtype), w, preferred_element_type=jnp.float32)
    o_ref[...] = out.astype(o_ref.dtype)


def _vmem_bytes_needed(tm, num_layers, hidden, x_itemsize, w_itemsize, out_itemsize):
    x_tile = num_layers * tm * hidden * x_itemsize        # one x input buffer
    out_tile = tm * hidden * out_itemsize                 # one output buffer
    w_bytes = hidden * hidden * w_itemsize + hidden * 4   # W + f32 v row
    f32_row = tm * hidden * 4                             # one f32 (tm,H) slab
    softmax_state = 4 * tm * 128 * 4                      # (tm,L) slabs, lane-padded
    # double-buffered x/out, two copies of the resident weights (conservative),
    # ~6 live f32 (tm,H) temporaries for the grouped mix + projection operands.
    return 2 * x_tile + 2 * out_tile + 2 * w_bytes + 6 * f32_row + softmax_state


def _tpu_vmem_capacity_bytes():
    try:
        return int(pltpu.get_tpu_info().vmem_capacity_bytes)
    except Exception:
        return 64 << 20        # conservative fallback (v7x per-TC VMEM)


_TM_CANDIDATES = (1024, 512, 384, 256, 128, 64, 32, 16, 8)


def _choose_tm(M, L, H, x_item, w_item, out_item, budget, multi_core):
    def fits(t):
        return _vmem_bytes_needed(t, L, H, x_item, w_item, out_item) <= budget

    cands = [c for c in _TM_CANDIDATES if c < M]          # all sublane-aligned (%8)
    if M <= 2048:
        cands = [M] + cands                               # full-M tile is layout-legal
    fitting = [c for c in cands if fits(c)]
    if not fitting:
        return min(M, 8)
    tm = fitting[0]                                       # largest fitting tile
    # v7x: the single "parallel" grid axis is sharded across 2 TensorCores;
    # prefer the largest fitting tile that gives an EVEN number of grid steps.
    if multi_core and M >= 256:
        even = [c for c in fitting
                if pl.cdiv(M, c) >= 2 and pl.cdiv(M, c) % 2 == 0]
        if even:
            tm = even[0]
    return tm


def adaptive_mixing_layer(layer_representations, v_q, w_q, *, tm=None):
    """layer_representations: (L, B, S, H); v_q: (H, 1); W_q: (H, H). Returns (B, S, H)."""
    L, B, S, H = layer_representations.shape
    M = B * S

    x_item = jnp.dtype(layer_representations.dtype).itemsize
    w_item = jnp.dtype(w_q.dtype).itemsize
    out_item = x_item

    cap = _tpu_vmem_capacity_bytes()
    if cap >= (100 << 20):       # v5e / v6e: 128 MiB VMEM, single TensorCore
        budget, limit_cap, multi_core = 88 << 20, 96 << 20, False
    else:                        # v7x: 64 MiB VMEM per TC, 2 TensorCores
        budget, limit_cap, multi_core = 40 << 20, 48 << 20, True

    if tm is None:
        tm = _choose_tm(M, L, H, x_item, w_item, out_item, budget, multi_core)
    tm = min(tm, M)

    grid_m = pl.cdiv(M, tm)
    needed = _vmem_bytes_needed(tm, L, H, x_item, w_item, out_item)
    vmem_limit = int(min(max(needed + (6 << 20), 32 << 20), limit_cap))

    # Free glue: (L,B,S,H) -> (L,M,H) merges contiguous dims; fold the hardcoded
    # 1/sqrt(768) scale (faithful to the PyTorch source, even when H != 768)
    # into an f32 (1,H) query row so logits get f32 accumulation on the VPU.
    x = layer_representations.reshape(L, M, H)
    v_row = (v_q.astype(jnp.float32) / math.sqrt(768.0)).reshape(1, H)

    out = pl.pallas_call(
        _aml_kernel,
        out_shape=jax.ShapeDtypeStruct((M, H), layer_representations.dtype),
        grid_spec=pltpu.PrefetchScalarGridSpec(
            num_scalar_prefetch=0,
            grid=(grid_m,),
            in_specs=[
                pl.BlockSpec((L, tm, H), lambda i: (0, i, 0)),   # x tile
                pl.BlockSpec((1, H), lambda i: (0, 0)),          # v row (resident)
                pl.BlockSpec((H, H), lambda i: (0, 0)),          # W (resident)
            ],
            out_specs=pl.BlockSpec((tm, H), lambda i: (i, 0)),
        ),
        compiler_params=pltpu.CompilerParams(
            dimension_semantics=("parallel",),
            vmem_limit_bytes=vmem_limit,
        ),
    )(x, v_row, w_q)

    return out.reshape(B, S, H)


def _reference(layer_representations, v_q, w_q):
    # Pure-JAX reference mirroring the PyTorch forward exactly (f32 math).
    logits = jnp.einsum("lbsh,ho->lbso", layer_representations, v_q)   # (L,B,S,1)
    logits = jnp.transpose(logits, (1, 2, 0, 3)) / math.sqrt(768.0)    # (B,S,L,1)
    atten = jax.nn.softmax(logits, axis=2)                             # (B,S,L,1)
    xp = jnp.transpose(layer_representations, (1, 2, 3, 0))            # (B,S,H,L)
    atten_h = jnp.squeeze(jnp.matmul(xp, atten), -1)                   # (B,S,H)
    return jnp.matmul(atten_h, w_q)                                    # (B,S,H)


if __name__ == "__main__":
    # Pin matmul precision so the f32 reference and the kernel's MXU projection
    # use the same (full f32) arithmetic — the previous failure came from the
    # approx softmax reciprocal plus default-precision matmuls.
    jax.config.update("jax_default_matmul_precision", "highest")

    # Small deterministic shapes: L layers, batch B, seq S, hidden H.
    L, B, S, H = 4, 2, 8, 32

    key = jax.random.PRNGKey(0)
    k_x, k_v, k_w = jax.random.split(key, 3)

    layer_representations = jax.random.normal(k_x, (L, B, S, H), dtype=jnp.float32)

    # Deterministic kaiming_normal_-style init (gain=sqrt(2), fan_in mode).
    v_q = jax.random.normal(k_v, (H, 1), dtype=jnp.float32) * math.sqrt(2.0 / 1.0)
    w_q = jax.random.normal(k_w, (H, H), dtype=jnp.float32) * math.sqrt(2.0 / H)

    out = jax.block_until_ready(adaptive_mixing_layer(layer_representations, v_q, w_q))
    ref = jax.block_until_ready(_reference(layer_representations, v_q, w_q))

    np.testing.assert_allclose(np.asarray(out), np.asarray(ref), rtol=2e-3, atol=2e-3)

    print("KERNEL_OK")
</pallas_src>

<mosaic_0001>
module attributes {stable_mosaic.version = 11 : i64} {
  func.func @_aml_kernel(%arg0: i32, %arg1: memref<4x16x32xf32, #tpu.memory_space<vmem>>, %arg2: memref<1x32xf32, #tpu.memory_space<vmem>>, %arg3: memref<32x32xf32, #tpu.memory_space<vmem>>, %arg4: memref<16x32xf32, #tpu.memory_space<vmem>>) attributes {dimension_semantics = [#tpu.dimension_semantics<parallel>], iteration_bounds = array<i64: 1>, scalar_prefetch = 0 : i64, scratch_operands = 0 : i64, tpu.core_type = #tpu.core_type<tc>, window_params = [{transform_indices = @transform_0, window_bounds = array<i64: 4, 16, 32>}, {pipeline_mode = #tpu.pipeline_mode<synchronous>, transform_indices = @transform_1, window_bounds = array<i64: 1, 32>}, {pipeline_mode = #tpu.pipeline_mode<synchronous>, transform_indices = @transform_2, window_bounds = array<i64: 32, 32>}, {transform_indices = @transform_3, window_bounds = array<i64: 16, 32>}]} {
    %c0 = arith.constant 0 : index
    %c0_0 = arith.constant 0 : index
    %0 = vector.load %arg2[%c0, %c0_0] : memref<1x32xf32, #tpu.memory_space<vmem>>, vector<1x32xf32>
    %c0_1 = arith.constant 0 : index
    %c0_2 = arith.constant 0 : index
    %1 = vector.load %arg3[%c0_1, %c0_2] : memref<32x32xf32, #tpu.memory_space<vmem>>, vector<32x32xf32>
    %c0_3 = arith.constant 0 : index
    %c0_4 = arith.constant 0 : index
    %c0_5 = arith.constant 0 : index
    %2 = vector.load %arg1[%c0_3, %c0_4, %c0_5] : memref<4x16x32xf32, #tpu.memory_space<vmem>>, vector<1x16x32xf32>
    %3 = vector.shape_cast %2 : vector<1x16x32xf32> to vector<16x32xf32>
    %4 = vector.broadcast %0 : vector<1x32xf32> to vector<16x32xf32>
    %5 = arith.mulf %3, %4 : vector<16x32xf32>
    %cst = arith.constant dense<0.000000e+00> : vector<16xf32>
    %6 = vector.multi_reduction <add>, %5, %cst [1] : vector<16x32xf32> to vector<16xf32>
    %7 = vector.shape_cast %6 : vector<16xf32> to vector<16x1xf32>
    %c1 = arith.constant 1 : index
    %c0_6 = arith.constant 0 : index
    %c0_7 = arith.constant 0 : index
    %8 = vector.load %arg1[%c1, %c0_6, %c0_7] : memref<4x16x32xf32, #tpu.memory_space<vmem>>, vector<1x16x32xf32>
    %9 = vector.shape_cast %8 : vector<1x16x32xf32> to vector<16x32xf32>
    %10 = vector.broadcast %0 : vector<1x32xf32> to vector<16x32xf32>
    %11 = arith.mulf %9, %10 : vector<16x32xf32>
    %cst_8 = arith.constant dense<0.000000e+00> : vector<16xf32>
    %12 = vector.multi_reduction <add>, %11, %cst_8 [1] : vector<16x32xf32> to vector<16xf32>
    %13 = vector.shape_cast %12 : vector<16xf32> to vector<16x1xf32>
    %c2 = arith.constant 2 : index
    %c0_9 = arith.constant 0 : index
    %c0_10 = arith.constant 0 : index
    %14 = vector.load %arg1[%c2, %c0_9, %c0_10] : memref<4x16x32xf32, #tpu.memory_space<vmem>>, vector<1x16x32xf32>
    %15 = vector.shape_cast %14 : vector<1x16x32xf32> to vector<16x32xf32>
    %16 = vector.broadcast %0 : vector<1x32xf32> to vector<16x32xf32>
    %17 = arith.mulf %15, %16 : vector<16x32xf32>
    %cst_11 = arith.constant dense<0.000000e+00> : vector<16xf32>
    %18 = vector.multi_reduction <add>, %17, %cst_11 [1] : vector<16x32xf32> to vector<16xf32>
    %19 = vector.shape_cast %18 : vector<16xf32> to vector<16x1xf32>
    %c3 = arith.constant 3 : index
    %c0_12 = arith.constant 0 : index
    %c0_13 = arith.constant 0 : index
    %20 = vector.load %arg1[%c3, %c0_12, %c0_13] : memref<4x16x32xf32, #tpu.memory_space<vmem>>, vector<1x16x32xf32>
    %21 = vector.shape_cast %20 : vector<1x16x32xf32> to vector<16x32xf32>
    %22 = vector.broadcast %0 : vector<1x32xf32> to vector<16x32xf32>
    %23 = arith.mulf %21, %22 : vector<16x32xf32>
    %cst_14 = arith.constant dense<0.000000e+00> : vector<16xf32>
    %24 = vector.multi_reduction <add>, %23, %cst_14 [1] : vector<16x32xf32> to vector<16xf32>
    %25 = vector.shape_cast %24 : vector<16xf32> to vector<16x1xf32>
    %26 = tpu.concatenate %7, %13, %19, %25 in 1 : vector<16x1xf32>, vector<16x1xf32>, vector<16x1xf32>, vector<16x1xf32> -> vector<16x4xf32>
    %cst_15 = arith.constant dense<0xFF800000> : vector<16xf32>
    %27 = vector.multi_reduction <maximumf>, %26, %cst_15 [1] : vector<16x4xf32> to vector<16xf32>
    %28 = vector.shape_cast %27 : vector<16xf32> to vector<16x1xf32>
    %29 = vector.broadcast %28 : vector<16x1xf32> to vector<16x4xf32>
    %30 = arith.subf %26, %29 : vector<16x4xf32>
    %31 = math.exp %30 : vector<16x4xf32>
    %cst_16 = arith.constant dense<0.000000e+00> : vector<16xf32>
    %32 = vector.multi_reduction <add>, %31, %cst_16 [1] : vector<16x4xf32> to vector<16xf32>
    %33 = vector.shape_cast %32 : vector<16xf32> to vector<16x1xf32>
    %34 = vector.broadcast %33 : vector<16x1xf32> to vector<16x4xf32>
    %35 = arith.divf %31, %34 : vector<16x4xf32>
    %c0_17 = arith.constant 0 : index
    %c0_18 = arith.constant 0 : index
    %c0_19 = arith.constant 0 : index
    %36 = vector.load %arg1[%c0_17, %c0_18, %c0_19] : memref<4x16x32xf32, #tpu.memory_space<vmem>>, vector<1x16x32xf32>
    %37 = vector.shape_cast %36 : vector<1x16x32xf32> to vector<16x32xf32>
    %38 = vector.extract_strided_slice %35 {offsets = [0, 0], sizes = [16, 1], strides = [1, 1]} : vector<16x4xf32> to vector<16x1xf32>
    %39 = vector.broadcast %38 : vector<16x1xf32> to vector<16x32xf32>
    %40 = arith.mulf %37, %39 : vector<16x32xf32>
    %c1_20 = arith.constant 1 : index
    %c0_21 = arith.constant 0 : index
    %c0_22 = arith.constant 0 : index
    %41 = vector.load %arg1[%c1_20, %c0_21, %c0_22] : memref<4x16x32xf32, #tpu.memory_space<vmem>>, vector<1x16x32xf32>
    %42 = vector.shape_cast %41 : vector<1x16x32xf32> to vector<16x32xf32>
    %43 = vector.extract_strided_slice %35 {offsets = [0, 1], sizes = [16, 1], strides = [1, 1]} : vector<16x4xf32> to vector<16x1xf32>
    %44 = vector.broadcast %43 : vector<16x1xf32> to vector<16x32xf32>
    %45 = arith.mulf %42, %44 : vector<16x32xf32>
    %46 = arith.addf %40, %45 : vector<16x32xf32>
    %c2_23 = arith.constant 2 : index
    %c0_24 = arith.constant 0 : index
    %c0_25 = arith.constant 0 : index
    %47 = vector.load %arg1[%c2_23, %c0_24, %c0_25] : memref<4x16x32xf32, #tpu.memory_space<vmem>>, vector<1x16x32xf32>
    %48 = vector.shape_cast %47 : vector<1x16x32xf32> to vector<16x32xf32>
    %49 = vector.extract_strided_slice %35 {offsets = [0, 2], sizes = [16, 1], strides = [1, 1]} : vector<16x4xf32> to vector<16x1xf32>
    %50 = vector.broadcast %49 : vector<16x1xf32> to vector<16x32xf32>
    %51 = arith.mulf %48, %50 : vector<16x32xf32>
    %52 = arith.addf %46, %51 : vector<16x32xf32>
    %c3_26 = arith.constant 3 : index
    %c0_27 = arith.constant 0 : index
    %c0_28 = arith.constant 0 : index
    %53 = vector.load %arg1[%c3_26, %c0_27, %c0_28] : memref<4x16x32xf32, #tpu.memory_space<vmem>>, vector<1x16x32xf32>
    %54 = vector.shape_cast %53 : vector<1x16x32xf32> to vector<16x32xf32>
    %55 = vector.extract_strided_slice %35 {offsets = [0, 3], sizes = [16, 1], strides = [1, 1]} : vector<16x4xf32> to vector<16x1xf32>
    %56 = vector.broadcast %55 : vector<16x1xf32> to vector<16x32xf32>
    %57 = arith.mulf %54, %56 : vector<16x32xf32>
    %58 = arith.addf %52, %57 : vector<16x32xf32>
    %cst_29 = arith.constant dense<0.000000e+00> : vector<16x32xf32>
    %59 = tpu.matmul %58, %1, %cst_29 {dimension_numbers = #tpu.dot_dimension_numbers<[1], [0], [0], [1], [0, 0, 1, 1], [], []>, precision = #tpu.contract_precision<fp32>} : vector<16x32xf32>, vector<32x32xf32>, vector<16x32xf32> -> vector<16x32xf32>
    %c0_30 = arith.constant 0 : index
    %c0_31 = arith.constant 0 : index
    %60 = vector.load %arg4[%c0_30, %c0_31] : memref<16x32xf32, #tpu.memory_space<vmem>>, vector<16x32xf32>
    tpu.vector_store %arg4[%c0_30, %c0_31], %59 {strides = array<i32>} : memref<16x32xf32, #tpu.memory_space<vmem>>, vector<16x32xf32>,
    return
  }
  func.func @transform_0(%arg0: i32) -> (i32, i32, i32) {
    %c0_i32 = arith.constant 0 : i32
    %c0_i32_0 = arith.constant 0 : i32
    %c0_i32_1 = arith.constant 0 : i32
    return %c0_i32, %arg0, %c0_i32_0 : i32, i32, i32
  }
  func.func @transform_1(%arg0: i32) -> (i32, i32) {
    %c0_i32 = arith.constant 0 : i32
    %c0_i32_0 = arith.constant 0 : i32
    %c0_i32_1 = arith.constant 0 : i32
    return %c0_i32, %c0_i32_0 : i32, i32
  }
  func.func @transform_2(%arg0: i32) -> (i32, i32) {
    %c0_i32 = arith.constant 0 : i32
    %c0_i32_0 = arith.constant 0 : i32
    %c0_i32_1 = arith.constant 0 : i32
    return %c0_i32, %c0_i32_0 : i32, i32
  }
  func.func @transform_3(%arg0: i32) -> (i32, i32) {
    %c0_i32 = arith.constant 0 : i32
    %c0_i32_0 = arith.constant 0 : i32
    return %arg0, %c0_i32 : i32, i32
  }
}

</mosaic_0001>

<bundles_post_ra>
// kernel: tpu_custom_call.1
= control target key start
LH: loop header
LB: loop body
LE: loop exit
PB: predicated region body
PF: predicated region fallthrough
CT: control target
= control target key end

     0   :  { %8 = vsyncpa [#allocation3], 0  ;;  %s1130_s0 = inlined_call_operand.hbm [shape: f32[4,16,32], index: 0, kind: input, shape index: {}]   ;;  %s1131_s1 = inlined_call_operand.vmem [shape: f32[1,32], index: 1, kind: input, shape index: {}]   ;;  %s1132_s2 = inlined_call_operand.hbm [shape: f32[32,32], index: 2, kind: input, shape index: {}]   ;;  %s1133_s3 = inlined_call_operand.hbm [shape: f32[16,32], index: 3, kind: output, shape index: {}]  }
   0x1   :  { %9 = vsyncpa [#allocation6], 0 }
   0x2   :  { %10 = vsyncpa [#allocation4], 0  ;;  %s989_s12 = smov [#allocation2]   ;;  %s917_s16 = scalar_lea.hbm %s1130_s0, 1024 }
   0x3   :  { %s16_s13 = sshll.u32 %s989_s12, 4  ;;  %p918_p0 = scmp.ne.s32.totalorder %s1130_s0, %s917_s16  ;;  %s17_s13 = int_to_ptr.vmem [resolvable:$true] %s16_s13 }
   0x4   :  { %p921_p1 = scmp.lt.u32.totalorder %s917_s16, %s1130_s0 }
   0x6   :  { %p923_p2 = pnand %p921_p1, %p918_p0 }
   0x8   :  { %926 = shalt.err (!%p923_p2)
}
   0x9   :  { %s927_s21 = scalar_lea.vmem %s17_s13, 1024  ;;  %p932_p4 = scmp.lt.s32.totalorder %s17_s13, %s17_s13 }
   0xa   :  { %p928_p3 = scmp.ne.s32.totalorder %s17_s13, %s927_s21  ;;  %p933_p5 = scmp.lt.s32.totalorder %s927_s21, %s927_s21 }
   0xc   :  { %p934_p6 = por %p933_p5, %p932_p4 }
   0xe   :  { %p935_p7 = pnand %p934_p6, %p928_p3 }
  0x10   :  { %938 = shalt.err (!%p935_p7)
}
  0x11   :  { %s990_s22 = smov 128   ;;  %s991_s23 = smov 8  }
  0x12   :  { %22 = dma.hbm_to_vmem [thread:$0]  %s1130_s0, 1024, %s17_s13, [#allocation3], %s990_s22, %s990_s22, %s991_s23  }
  0x13   :  { %s992_s26 = smov [#allocation5]   ;;  %s939_s30 = scalar_lea.hbm %s1132_s2, 512 }
  0x14   :  { %s30_s27 = sshll.u32 %s992_s26, 4  ;;  %p940_p8 = scmp.ne.s32.totalorder %s1132_s2, %s939_s30  ;;  %s31_s27 = int_to_ptr.vmem [resolvable:$true] %s30_s27 }
  0x15   :  { %p943_p9 = scmp.lt.u32.totalorder %s939_s30, %s1132_s2 }
  0x17   :  { %p945_p10 = pnand %p943_p9, %p940_p8 }
  0x19   :  { %948 = shalt.err (!%p945_p10)
}
  0x1a   :  { %s949_s8 = scalar_lea.vmem %s31_s27, 512  ;;  %p954_p12 = scmp.lt.s32.totalorder %s31_s27, %s31_s27 }
  0x1b   :  { %p950_p11 = scmp.ne.s32.totalorder %s31_s27, %s949_s8  ;;  %p955_p13 = scmp.lt.s32.totalorder %s949_s8, %s949_s8 }
  0x1d   :  { %p956_p0 = por %p955_p13, %p954_p12 }
  0x1f   :  { %p957_p1 = pnand %p956_p0, %p950_p11 }
  0x21   :  { %960 = shalt.err (!%p957_p1)
}
  0x22   :  { %36 = dma.hbm_to_vmem [thread:$0]  %s1132_s2, 512, %s31_s27, [#allocation6], %s990_s22, %s990_s22, %s991_s23  }
  0x23   :  { %983 = dma.done.wait [#allocation3], 1024  }
  0x24   :  { %984 = vsyncadd [#allocation3], 4294966272 }
  0x25   :  { %985 = dma.done.wait [#allocation6], 512  }
  0x26   :  { %986 = vsyncadd [#allocation6], 4294966784  ;;  %v732_v0 = vld [vmem:[%s1131_s1] ss:$0 sm:$0xff]  ;;  %v1051_v1 = vld [vmem:[#allocation2 + $0x8] sm:$0xff]  ;;  %vm58_vm0 = vcmask 261120  }
  0x27   :  { %v1053_v2 = vld [vmem:[#allocation2] sm:$0xff]  ;;  %v57_v3 = vmul.f32 %v732_v0, %v1051_v1  ;;  %v1057_v5 = vld [vmem:[#allocation2 + $0x18] sm:$0xff]  ;;  %v1059_v6 = vld [vmem:[#allocation2 + $0x10] sm:$0xff]  ;;  %vm98_vm1 = vcmask 7168   ;;  %vm101_vm2 = vcmask 15360   ;;  %vm104_vm3 = vcmask 23552  }
  0x28   :  { %v56_v4 = vmul.f32 %v732_v0, %v1053_v2  ;;  %v69_v7 = vmul.f32 %v732_v0, %v1057_v5  ;;  %v68_v8 = vmul.f32 %v732_v0, %v1059_v6  ;;  %v1063_v9 = vld [vmem:[#allocation2 + $0x28] sm:$0xff]  ;;  %v1065_v10 = vld [vmem:[#allocation2 + $0x20] sm:$0xff]  ;;  %v1073_v17 = vld [vmem:[#allocation2 + $0x38] sm:$0xff]  ;;  %vm107_vm4 = vcmask 31744   ;;  %s997_s1 = smov [#allocation7]  }
  0x29   :  { %v62_v11 = vsel %vm58_vm0, %v57_v3, 0.0  ;;  %v80_v15 = vmul.f32 %v732_v0, %v1063_v9  ;;  %v79_v16 = vmul.f32 %v732_v0, %v1065_v10  ;;  %v1075_v18 = vld [vmem:[#allocation2 + $0x30] sm:$0xff]  ;;  %v91_v21 = vmul.f32 %v732_v0, %v1073_v17  ;;  %v44_v61 = vld [vmem:[#allocation5] sm:$0xff]  ;;  %v45_v62 = vld [vmem:[#allocation5 + $0x8] sm:$0xff]  ;;  %s719_s2 = sshll.u32 %s997_s1, 4  ;;  %s720_s2 = int_to_ptr.vmem [resolvable:$true] %s719_s2 }
  0x2a   :  { %v59_v12 = vsel %vm58_vm0, %v56_v4, 0.0  ;;  %63 = vadd.xlane.f32.xlu1 %v62_v11  ;;  %v73_v13 = vsel %vm58_vm0, %v69_v7, 0.0  ;;  %v70_v14 = vsel %vm58_vm0, %v68_v8, 0.0  ;;  %v90_v22 = vmul.f32 %v732_v0, %v1075_v18  ;;  %v46_v4 = vld [vmem:[#allocation5 + $0x10] sm:$0xff]  ;;  %v47_v7 = vld [vmem:[#allocation5 + $0x18] sm:$0xff]  ;;  %s961_s12 = scalar_lea.vmem %s720_s2, 256  ;;  %p966_p3 = scmp.lt.s32.totalorder %s720_s2, %s720_s2 }
  0x2b   :  { %60 = vadd.xlane.f32.xlu0 %v59_v12  ;;  %v84_v19 = vsel %vm58_vm0, %v80_v15, 0.0  ;;  %v81_v20 = vsel %vm58_vm0, %v79_v16, 0.0  ;;  %v95_v23 = vsel %vm58_vm0, %v91_v21, 0.0  ;;  %v993_v51 = vmov 1   ;;  %p962_p2 = scmp.ne.s32.totalorder %s720_s2, %s961_s12  ;;  %p967_p4 = scmp.lt.s32.totalorder %s961_s12, %s961_s12 }
  0x2c   :  { %v92_v24 = vsel %vm58_vm0, %v90_v22, 0.0  ;;  %903 = vset.pattern.permute.xlu1 %v993_v51  ;;  %v994_v52 = vmov 0   ;;  %v995_v59 = vmov 3   ;;  %v996_v60 = vmov 2  }
  0x2d   :  { %902 = vset.pattern.permute.xlu0 %v994_v52  ;;  %v185_v63 = vand.u32 4294901760, %v44_v61  ;;  %v188_v0 = vand.u32 4294901760, %v45_v62  ;;  %v191_v8 = vand.u32 4294901760, %v46_v4  ;;  %v194_v11 = vand.u32 4294901760, %v47_v7  ;;  %p968_p5 = por %p967_p4, %p966_p3 }
  0x2e   :  { %74 = vadd.xlane.f32.xlu1 %v73_v13 }
  0x2f   :  { %71 = vadd.xlane.f32.xlu0 %v70_v14  ;;  %v1087_v3 = vpack.c.bf16 %v188_v0, %v185_v63  ;;  %v1093_v12 = vpack.c.bf16 %v194_v11, %v191_v8  ;;  %v275_v13 = vsub.f32 %v44_v61, %v185_v63  ;;  %v282_v14 = vsub.f32 %v45_v62, %v188_v0  ;;  %p969_p6 = pnand %p968_p5, %p962_p2 }
  0x30   :  { %v289_v22 = vsub.f32 %v46_v4, %v191_v8 }
  0x31   :  { %860 = vmatprep.subr.bf16.mxu0 %v1087_v3  ;;  %836 = vmatprep.subr.bf16.mxu1 %v1087_v3  ;;  %v276_v15 = vand.u32 4294901760, %v275_v13  ;;  %v283_v16 = vand.u32 4294901760, %v282_v14 }
  0x32   :  { %85 = vadd.xlane.f32.xlu1 %v84_v19  ;;  %862 = vmatpush3.bf16.msra.mxu0 %v1087_v3 }
  0x33   :  { %82 = vadd.xlane.f32.xlu0 %v81_v20  ;;  %838 = vmatpush3.bf16.msra.mxu1 %v1087_v3  ;;  %v867_v19 = vpack.c.bf16 %v283_v16, %v276_v15  ;;  %v277_v20 = vsub.f32 %v275_v13, %v276_v15  ;;  %v284_v21 = vsub.f32 %v282_v14, %v283_v16 }
  0x34   :  { %864 = vmatprep.subr.bf16.mxu0 %v1093_v12  ;;  %840 = vmatprep.subr.bf16.mxu1 %v1093_v12 }
  0x36   :  { %96 = vadd.xlane.f32.xlu1 %v95_v23  ;;  %866 = vmatpush3.bf16.msra.mxu0 %v1093_v12  ;;  %v296_v23 = vsub.f32 %v47_v7, %v194_v11 }
  0x37   :  { %93 = vadd.xlane.f32.xlu0 %v92_v24  ;;  %842 = vmatpush3.bf16.msra.mxu1 %v1093_v12  ;;  %v278_v24 = vand.u32 4294901760, %v277_v20 }
  0x38   :  { %868 = vmatprep.subr.bf16.mxu0 %v867_v19 }
  0xb7   :  { %v64_v25 = vpop.xlane.xlu1 %63 }
  0xb8   :  { %v61_v26 = vpop.xlane.xlu0 %60 }
  0xbb   :  { %v75_v27 = vpop.xlane.xlu1 %74 }
  0xbc   :  { %v72_v28 = vpop.xlane.xlu0 %71  ;;  %v100_v31 = vsel %vm98_vm1, %v64_v25, %v75_v27  ;;  %v285_v25 = vand.u32 4294901760, %v284_v21  ;;  %v297_v27 = vand.u32 4294901760, %v296_v23 }
  0xbd   :  { %v99_v32 = vsel %vm98_vm1, %v61_v26, %v72_v28  ;;  %v290_v26 = vand.u32 4294901760, %v289_v22 }
  0xbe   :  { %v843_v28 = vpack.c.bf16 %v285_v25, %v278_v24 }
  0xbf   :  { %v86_v29 = vpop.xlane.xlu1 %85 }
  0xc0   :  { %v83_v30 = vpop.xlane.xlu0 %82  ;;  %v103_v33 = vsel %vm101_vm2, %v100_v31, %v86_v29  ;;  %v871_v29 = vpack.c.bf16 %v297_v27, %v290_v26  ;;  %v298_v31 = vsub.f32 %v296_v23, %v297_v27  ;;  %844 = vmatprep.subr.bf16.mxu1 %v843_v28 }
  0xc1   :  { %v102_v34 = vsel %vm101_vm2, %v99_v32, %v83_v30  ;;  %v291_v30 = vsub.f32 %v289_v22, %v290_v26 }
  0xc3   :  { %v97_v35 = vpop.xlane.xlu1 %96  ;;  %v292_v32 = vand.u32 4294901760, %v291_v30 }
  0xc4   :  { %v94_v36 = vpop.xlane.xlu0 %93  ;;  %v106_v37 = vsel %vm104_vm3, %v103_v33, %v97_v35  ;;  %v299_v33 = vand.u32 4294901760, %v298_v31  ;;  %v851_v35 = vpack.c.bf16 %v282_v14, %v275_v13 }
  0xc5   :  { %v105_v38 = vsel %vm104_vm3, %v102_v34, %v94_v36  ;;  %v111_v39 = vsel %vm107_vm4, %v106_v37, -inf  ;;  %v855_v36 = vpack.c.bf16 %v296_v23, %v289_v22 }
  0xc6   :  { %v108_v40 = vsel %vm107_vm4, %v105_v38, -inf  ;;  %112 = vmax.xlane.f32.xlu1 %v111_v39  ;;  %v847_v34 = vpack.c.bf16 %v299_v33, %v292_v32 }
  0xc7   :  { %109 = vmax.xlane.f32.xlu0 %v108_v40 }
 0x153   :  { %v113_v41 = vpop.xlane.xlu1 %112 }
 0x154   :  { %v110_v42 = vpop.xlane.xlu0 %109  ;;  %v115_v43 = vsub.f32 %v106_v37, %v113_v41 }
 0x155   :  { %v114_v44 = vsub.f32 %v105_v38, %v110_v42 }
 0x156   :  { %v118_v45 = vmul.f32 1.442695, %v115_v43 }
 0x157   :  { %v116_v46 = vmul.f32 1.442695, %v114_v44 }
 0x158   :  { %909 = vpow2.f32 %v118_v45 }
 0x159   :  { %911 = vpow2.f32 %v116_v46 }
 0x162   :  { %v910_v47 = vpop.eup %909 }
 0x163   :  { %v912_v48 = vpop.eup %911  ;;  %v123_v49 = vsel %vm107_vm4, %v910_v47, 0.0 }
 0x164   :  { %124 = vadd.xlane.f32.xlu1 %v123_v49  ;;  %v120_v50 = vsel %vm107_vm4, %v912_v48, 0.0 }
 0x165   :  { %121 = vadd.xlane.f32.xlu0 %v120_v50 }
 0x1f1   :  { %v125_v54 = vpop.xlane.xlu1 %124 }
 0x1f2   :  { %v122_v53 = vpop.xlane.xlu0 %121 }
 0x1f3   :  { %913 = vrcp.f32 %v122_v53 }
 0x1f4   :  { %915 = vrcp.f32 %v125_v54 }
 0x1fd   :  { %v914_v55 = vpop.eup %913 }
 0x1fe   :  { %v127_v56 = vmul.f32 %v914_v55, %v912_v48  ;;  %v916_v57 = vpop.eup %915 }
 0x1ff   :  { %v129_v58 = vmul.f32 %v916_v57, %v910_v47 }
 0x200   :  { %143 = vperm.xlu1 %903, %v127_v56   ;;  %132 = vperm.xlu0 %902, %v127_v56  }
 0x204   :  { %904 = vset.pattern.permute.xlu1 %v994_v52  ;;  %908 = vset.pattern.permute.xlu0 %v995_v59 }
 0x205   :  { %137 = vperm.xlu1 %904, %v129_v58  }
 0x209   :  { %905 = vset.pattern.permute.xlu1 %v993_v51 }
 0x20a   :  { %147 = vperm.xlu1 %905, %v129_v58  }
 0x20e   :  { %906 = vset.pattern.permute.xlu1 %v996_v60 }
 0x20f   :  { %155 = vperm.xlu1 %906, %v127_v56  }
 0x213   :  { %159 = vperm.xlu1 %906, %v129_v58  }
 0x217   :  { %907 = vset.pattern.permute.xlu1 %v995_v59 }
 0x218   :  { %167 = vperm.xlu1 %907, %v127_v56  }
 0x21c   :  { %171 = vperm.xlu1 %907, %v129_v58  }
 0x27f   :  { %v144_v37 = vpop.permute.xlu1 %143  ;;  %v133_v41 = vpop.permute.xlu0 %132 }
 0x280   :  { %v150_v42 = vmul.f32 %v144_v37, %v1059_v6  ;;  %v140_v43 = vmul.f32 %v133_v41, %v1053_v2 }
 0x282   :  { %v152_v46 = vadd.f32 %v150_v42, %v140_v43 }
 0x284   :  { %v138_v38 = vpop.permute.xlu1 %137 }
 0x285   :  { %v141_v49 = vmul.f32 %v138_v38, %v1051_v1 }
 0x289   :  { %v148_v39 = vpop.permute.xlu1 %147 }
 0x28a   :  { %v151_v47 = vmul.f32 %v148_v39, %v1057_v5 }
 0x28c   :  { %v153_v53 = vadd.f32 %v151_v47, %v141_v49 }
 0x28e   :  { %v156_v40 = vpop.permute.xlu1 %155 }
 0x28f   :  { %v162_v45 = vmul.f32 %v156_v40, %v1065_v10 }
 0x291   :  { %v164_v50 = vadd.f32 %v162_v45, %v152_v46 }
 0x292   :  { %v160_v44 = vpop.permute.xlu1 %159 }
 0x293   :  { %v163_v51 = vmul.f32 %v160_v44, %v1063_v9 }
 0x295   :  { %v165_v6 = vadd.f32 %v163_v51, %v153_v53 }
 0x297   :  { %v168_v48 = vpop.permute.xlu1 %167 }
 0x298   :  { %v174_v52 = vmul.f32 %v168_v48, %v1075_v18 }
 0x29a   :  { %v176_v54 = vadd.f32 %v174_v52, %v164_v50 }
 0x29b   :  { %v172_v55 = vpop.permute.xlu1 %171 }
 0x29c   :  { %v179_v2 = vsel %vm58_vm0, %v176_v54, 0  ;;  %v175_v56 = vmul.f32 %v172_v55, %v1073_v17 }
 0x29d   :  { %v253_v10 = vand.u32 4294901760, %v179_v2 }
 0x29e   :  { %v177_v57 = vadd.f32 %v175_v56, %v165_v6 }
 0x29f   :  { %v254_v58 = vsub.f32 %v179_v2, %v253_v10 }
 0x2a0   :  { %v182_v5 = vsel %vm58_vm0, %v177_v57, 0 }
 0x2a1   :  { %v263_v59 = vand.u32 4294901760, %v182_v5  ;;  %v255_v1 = vand.u32 4294901760, %v254_v58 }
 0x2a3   :  { %v264_v60 = vsub.f32 %v182_v5, %v263_v59  ;;  %810 = vmatprep.mubr.f32.mxu0 %v255_v1  ;;  %v256_v9 = vsub.f32 %v254_v58, %v255_v1 }
 0x2a5   :  { %v257_v61 = vand.u32 4294901760, %v256_v9  ;;  %v265_v18 = vand.u32 4294901760, %v264_v60 }
 0x2a7   :  { %777 = vmatprep.mubr.f32.mxu1 %v257_v61  ;;  %811 = vmatmul.mubr.f32.vlgmr.msra.gmra.mrb[0].mxu0 %v265_v18  ;;  %v266_v62 = vsub.f32 %v264_v60, %v265_v18 }
 0x2a8   :  { %870 = vmatpush3.bf16.msra.mxu0 %v867_v19  ;;  %821 = vmatprep.mubr.f32.mxu0 %v253_v10 }
 0x2a9   :  { %v267_v63 = vand.u32 4294901760, %v266_v62  ;;  %872 = vmatprep.subr.bf16.mxu0 %v871_v29 }
 0x2ab   :  { %778 = vmatmul.mubr.f32.vlgmr.msra.gmra.mrb[0].mxu1 %v267_v63 }
 0x2ac   :  { %846 = vmatpush3.bf16.msra.mxu1 %v843_v28  ;;  %788 = vmatprep.mubr.f32.mxu1 %v253_v10 }
 0x2ad   :  { %874 = vmatpush3.bf16.msra.mxu0 %v871_v29  ;;  %848 = vmatprep.subr.bf16.mxu1 %v847_v34 }
 0x2ae   :  { %876 = vmatprep.subr.bf16.mxu0 %v1087_v3 }
 0x2b0   :  { %850 = vmatpush3.bf16.msra.mxu1 %v847_v34  ;;  %822 = vmatmul.mubr.f32.vlgmr.msra.gmra.mrb[0].mxu0 %v263_v59 }
 0x2b1   :  { %878 = vmatpush3.bf16.msra.mxu0 %v1087_v3  ;;  %832 = vmatprep.mubr.f32.mxu0 %v253_v10 }
 0x2b2   :  { %852 = vmatprep.subr.bf16.mxu1 %v851_v35  ;;  %880 = vmatprep.subr.bf16.mxu0 %v1093_v12 }
 0x2b3   :  { %789 = vmatmul.mubr.f32.vlgmr.msra.gmra.mrb[0].mxu1 %v263_v59 }
 0x2b4   :  { %854 = vmatpush3.bf16.msra.mxu1 %v851_v35  ;;  %799 = vmatprep.mubr.f32.mxu1 %v254_v58 }
 0x2b5   :  { %882 = vmatpush3.bf16.msra.mxu0 %v1093_v12  ;;  %856 = vmatprep.subr.bf16.mxu1 %v855_v36 }
 0x2b8   :  { %858 = vmatpush3.bf16.msra.mxu1 %v855_v36  ;;  %833 = vmatmul.mubr.f32.vlgmr.msra.gmra.mrb[0].mxu0 %v263_v59 }
 0x2bb   :  { %800 = vmatmul.mubr.f32.vlgmr.msra.gmra.mrb[0].mxu1 %v264_v60 }
 0x38b   :  { %v834_v17 = vpop.f32.mrb[0].mxu0 }
 0x38c   :  { %v702_v0 = vpop.f32.mrb[1].mxu0 }
 0x38e   :  { %v801_v4 = vpop.f32.mrb[0].mxu1 }
 0x38f   :  { %v883_v7 = vadd.f32 %v834_v17, %v801_v4  ;;  %v446_v3 = vpop.f32.mrb[1].mxu1 }
 0x390   :  { %v884_v8 = vadd.f32 %v702_v0, %v446_v3 }
 0x391   :  { %713 = vst.msk [vmem:[#allocation7 + $0x8] sm:$0xff] %vm58_vm0, %v883_v7 }
 0x392   :  { %712 = vst.msk [vmem:[#allocation7] sm:$0xff] %vm58_vm0, %v884_v8 }
 0x393   :  { %972 = shalt.err (!%p969_p6)
}
 0x394   :  { %s973_s15 = scalar_lea.hbm %s1133_s3, 256 }
 0x395   :  { %p974_p7 = scmp.ne.s32.totalorder %s1133_s3, %s973_s15  ;;  %p977_p8 = scmp.lt.u32.totalorder %s973_s15, %s1133_s3 }
 0x397   :  { %p979_p9 = pnand %p977_p8, %p974_p7 }
 0x399   :  { %982 = shalt.err (!%p979_p9)
}
 0x39a   :  { %725 = dma.vmem_to_hbm [thread:$0]  %s720_s2, 256, %s1133_s3, [#allocation4], %s990_s22, %s990_s22, %s991_s23  }
 0x39b   :  { %987 = dma.done.wait [#allocation4], 256  }
 0x39c   :  { %988 = vsyncadd [#allocation4], 4294967040 }
 0x39d   :  { %729 = vsyncpa [#allocation3], 1 }
 0x39e   :  { %730 = vsyncpa [#allocation6], 1 }
 0x39f   :  { %731 = vsyncpa [#allocation4], 1 }

</bundles_post_ra>
